<compile_context>
chip_gen: v6e
topology: v6e:2x2x1
jax: 0.10.0
libtpu: 0.0.40
codegen_flags: <defaults>
</compile_context>

<pallas_src>
import functools
import math

import jax
import jax.numpy as jnp
from jax.experimental import pallas as pl
from jax.experimental.pallas import tpu as pltpu


def _round_up(n, m):
    return ((n + m - 1) // m) * m


# ----------------------------- Pallas kernel ---------------------------------
def fused_supermask_mlp_kernel(x_ref, p_ref, o_ref, *, n_layers, pad):
    """Whole masked-MLP forward in one kernel (intermediates never leave vregs).

    x_ref : (B, pad)                 zero-padded input activations
    p_ref : (n_layers*(pad+8), pad)  concatenated param slab; per-layer block of pad+8 rows:
              rows [0:pad]          = (weight*subnet).T zero-padded to (pad, pad)
              row  [pad]            = (bias*subnetb)    zero-padded to (pad,)
              rows [pad+1 : pad+8]  = zero rows (sublane alignment of the next block)
    o_ref : (B, pad)                 lane-dense output slab; only [:, :Dout_final] meaningful
    """
    block = pad + 8
    h = x_ref[...]
    for li in range(n_layers):                       # static unroll (L is tiny)
        base = li * block                            # Python constant -> static slice
        w = p_ref[base:base + pad, :]                # (pad, pad)  no-cost sub-view
        b = p_ref[base + pad:base + pad + 1, :]      # (1, pad)    8-aligned row
        h = jnp.dot(h, w, preferred_element_type=jnp.float32) + b   # MXU + VPU
        if li < n_layers - 1:
            h = jnp.maximum(h, 0.0)                  # ReLU between all but last
    o_ref[...] = h.astype(o_ref.dtype)


def fused_forward(x, param_slab, *, n_layers, pad, din0):
    """Single pallas_call for the full network; returns the padded (B, pad) output slab."""
    B = x.shape[0]
    # Zero-pad input to lane-dense width; zeros contribute nothing through the zero-padded
    # weight rows, so semantics are unchanged.
    x_p = jnp.pad(x, ((0, 0), (0, pad - din0)))
    vmem = pl.BlockSpec(memory_space=pltpu.MemorySpace.VMEM)   # whole-array VMEM residency
    # NOTE: if batch ever grows past a few hundred rows, switch to a 1-D batch grid
    # (x/out BlockSpec ((TB, pad), lambda i: (i, 0)), param index_map lambda i: (0, 0),
    # dimension_semantics=("parallel",)) to pipeline DMAs and use v7x's second TensorCore.
    return pl.pallas_call(
        functools.partial(fused_supermask_mlp_kernel, n_layers=n_layers, pad=pad),
        out_shape=jax.ShapeDtypeStruct((B, pad), jnp.float32),
        in_specs=[vmem, vmem],
        out_specs=vmem,
    )(x_p, param_slab)


# --------------------------- GetSubnet (init-time glue) -----------------------
def get_subnet_mask(scores_abs, k):
    """Exact GetSubnet.forward semantics, scatter-free:
    bottom int((1-k)*numel) scores (ascending sort order) -> 0, rest -> 1.
    (Tie-breaking may differ from torch.sort for exactly-equal scores; benign for random
    float scores.)"""
    flat = scores_abs.reshape(-1)
    j = int((1.0 - k) * flat.size)
    ranks = jnp.argsort(jnp.argsort(flat))          # inverse permutation of ascending sort
    return (ranks >= j).astype(scores_abs.dtype).reshape(scores_abs.shape)


# ------------------------------ Model wrapper ---------------------------------
class PlantedTicketsPallas:
    """depth widths -> (depth-1) SupermaskLinear layers, ReLU between all but last."""

    def __init__(self, depth, width, dataset, sparsity, key):
        widths = [width] * depth
        if dataset == "circle":
            widths[0], widths[-1] = 2, 4
        elif dataset == "relu":
            widths[0], widths[-1] = 1, 1
        elif dataset == "helix":
            widths[0], widths[-1] = 1, 3
        else:
            raise ValueError("Dataset " + dataset + " not known.")
        self.widths = widths
        self.sparsity = sparsity

        # Raw (frozen) parameters, matching nn.Linear / kaiming_uniform init ranges.
        self.raw_params = []
        for i in range(depth - 1):
            din, dout = widths[i], widths[i + 1]
            key, kw, kb, ks, ksb = jax.random.split(key, 5)
            bound_w = 1.0 / math.sqrt(din)
            w = jax.random.uniform(kw, (dout, din), jnp.float32, -bound_w, bound_w)
            b = jax.random.uniform(kb, (dout,), jnp.float32, -bound_w, bound_w)
            # scores ~ kaiming_uniform(a=sqrt(5)): bound = sqrt(6/((1+a^2)*fan_in))
            bound_s = math.sqrt(6.0 / ((1.0 + 5.0) * din))
            scores = jax.random.uniform(ks, (dout, din), jnp.float32, -bound_s, bound_s)
            bound_sb = math.sqrt(6.0 / din)
            scoresb = jax.random.uniform(ksb, (dout,), jnp.float32, -bound_sb, bound_sb)
            self.raw_params.append((w, b, scores, scoresb))

        # Fold masks once (scores/weights are frozen -> forward semantics unchanged),
        # pre-transpose weights to (Din, Dout), zero-pad EVERY dim to P=128 lanes/sublanes,
        # and pack all layers into one lane-dense param slab of shape (L*(P+8), P).
        n_layers = depth - 1
        pad = _round_up(max(widths), 128)
        blocks = []
        for (w, b, scores, scoresb), (din, dout) in zip(
                self.raw_params, zip(widths[:-1], widths[1:])):
            mask = get_subnet_mask(jnp.abs(scores), sparsity)
            maskb = get_subnet_mask(jnp.abs(scoresb), sparsity)
            wm_t = (w * mask).T                                        # (Din, Dout)
            bm = (b * maskb).reshape(1, -1)                            # (1, Dout)
            wm_t_pad = jnp.pad(wm_t, ((0, pad - din), (0, pad - dout)))    # zeros: no leakage
            bm_pad = jnp.pad(bm, ((0, 0), (0, pad - dout)))
            align = jnp.zeros((7, pad), jnp.float32)                   # keep blocks 8-aligned
            blocks.append(jnp.concatenate([wm_t_pad, bm_pad, align], axis=0))
        self.param_slab = jnp.concatenate(blocks, axis=0)              # (L*(P+8), P)
        self.pad = pad
        self.n_layers = n_layers
        self.dout_final = widths[-1]

        self._forward = jax.jit(functools.partial(
            fused_forward, n_layers=n_layers, pad=pad, din0=widths[0]))

    def __call__(self, x):
        # Returns the lane-dense (B, pad) output slab; columns >= dout_final are zero.
        # Slice y[:, :dout_final] at the consumer (avoids a separate tiny slice op per call).
        return self._forward(x, self.param_slab)


# ------------------------------- Reference ------------------------------------
def reference_forward(model, x):
    """Pure-JAX reference replicating the original per-layer SupermaskLinear math."""
    n = len(model.raw_params)
    for li, (w, b, scores, scoresb) in enumerate(model.raw_params):
        mask = get_subnet_mask(jnp.abs(scores), model.sparsity)
        maskb = get_subnet_mask(jnp.abs(scoresb), model.sparsity)
        y = x @ (w * mask).T + (b * maskb)
        x = jnp.maximum(y, 0.0) if li < n - 1 else y
    return x


if __name__ == "__main__":
    key = jax.random.PRNGKey(0)
    kp, kx = jax.random.split(key)

    depth, width, dataset, sparsity = 4, 32, "circle", 0.5
    model = PlantedTicketsPallas(depth, width, dataset, sparsity, kp)

    batch = 8
    x = jax.random.normal(kx, (batch, model.widths[0]), jnp.float32)  # (8, 2)

    y_pad = model(x)                       # (8, 128) lane-dense slab
    y_pad = jax.block_until_ready(y_pad)
    y = y_pad[:, :model.dout_final]        # consumer-side slice to the true width (8, 4)

    y_ref = reference_forward(model, x)
    assert y_pad.shape == (batch, model.pad)
    assert y.shape == (batch, model.widths[-1])
    assert jnp.allclose(y, y_ref, atol=1e-5, rtol=1e-5), "mismatch vs reference"
    assert jnp.allclose(y_pad[:, model.dout_final:], 0.0), "padded lanes leaked nonzeros"

    print("KERNEL_OK")
</pallas_src>

<mosaic_0001>
module attributes {stable_mosaic.version = 11 : i64} {
  func.func @fused_supermask_mlp_kernel(%arg0: memref<8x128xf32, #tpu.memory_space<vmem>>, %arg1: memref<408x128xf32, #tpu.memory_space<vmem>>, %arg2: memref<8x128xf32, #tpu.memory_space<vmem>>) attributes {dimension_semantics = [], scalar_prefetch = 0 : i64, scratch_operands = 0 : i64, tpu.core_type = #tpu.core_type<tc>} {
    %c0 = arith.constant 0 : index
    %c0_0 = arith.constant 0 : index
    %0 = vector.load %arg0[%c0, %c0_0] : memref<8x128xf32, #tpu.memory_space<vmem>>, vector<8x128xf32>
    %c0_1 = arith.constant 0 : index
    %c0_2 = arith.constant 0 : index
    %1 = vector.load %arg1[%c0_1, %c0_2] : memref<408x128xf32, #tpu.memory_space<vmem>>, vector<128x128xf32>
    %c128 = arith.constant 128 : index
    %c0_3 = arith.constant 0 : index
    %2 = vector.load %arg1[%c128, %c0_3] : memref<408x128xf32, #tpu.memory_space<vmem>>, vector<1x128xf32>
    %cst = arith.constant dense<0.000000e+00> : vector<8x128xf32>
    %3 = tpu.matmul %0, %1, %cst {dimension_numbers = #tpu.dot_dimension_numbers<[1], [0], [0], [1], [0, 0, 1, 1], [], []>} : vector<8x128xf32>, vector<128x128xf32>, vector<8x128xf32> -> vector<8x128xf32>
    %4 = vector.broadcast %2 : vector<1x128xf32> to vector<8x128xf32>
    %5 = arith.addf %3, %4 : vector<8x128xf32>
    %cst_4 = arith.constant 0.000000e+00 : f32
    %6 = vector.broadcast %cst_4 : f32 to vector<8x128xf32>
    %7 = arith.maximumf %5, %6 : vector<8x128xf32>
    %c136 = arith.constant 136 : index
    %c0_5 = arith.constant 0 : index
    %8 = vector.load %arg1[%c136, %c0_5] : memref<408x128xf32, #tpu.memory_space<vmem>>, vector<128x128xf32>
    %c264 = arith.constant 264 : index
    %c0_6 = arith.constant 0 : index
    %9 = vector.load %arg1[%c264, %c0_6] : memref<408x128xf32, #tpu.memory_space<vmem>>, vector<1x128xf32>
    %cst_7 = arith.constant dense<0.000000e+00> : vector<8x128xf32>
    %10 = tpu.matmul %7, %8, %cst_7 {dimension_numbers = #tpu.dot_dimension_numbers<[1], [0], [0], [1], [0, 0, 1, 1], [], []>} : vector<8x128xf32>, vector<128x128xf32>, vector<8x128xf32> -> vector<8x128xf32>
    %11 = vector.broadcast %9 : vector<1x128xf32> to vector<8x128xf32>
    %12 = arith.addf %10, %11 : vector<8x128xf32>
    %cst_8 = arith.constant 0.000000e+00 : f32
    %13 = vector.broadcast %cst_8 : f32 to vector<8x128xf32>
    %14 = arith.maximumf %12, %13 : vector<8x128xf32>
    %c272 = arith.constant 272 : index
    %c0_9 = arith.constant 0 : index
    %15 = vector.load %arg1[%c272, %c0_9] : memref<408x128xf32, #tpu.memory_space<vmem>>, vector<128x128xf32>
    %c400 = arith.constant 400 : index
    %c0_10 = arith.constant 0 : index
    %16 = vector.load %arg1[%c400, %c0_10] : memref<408x128xf32, #tpu.memory_space<vmem>>, vector<1x128xf32>
    %cst_11 = arith.constant dense<0.000000e+00> : vector<8x128xf32>
    %17 = tpu.matmul %14, %15, %cst_11 {dimension_numbers = #tpu.dot_dimension_numbers<[1], [0], [0], [1], [0, 0, 1, 1], [], []>} : vector<8x128xf32>, vector<128x128xf32>, vector<8x128xf32> -> vector<8x128xf32>
    %18 = vector.broadcast %16 : vector<1x128xf32> to vector<8x128xf32>
    %19 = arith.addf %17, %18 : vector<8x128xf32>
    %c0_12 = arith.constant 0 : index
    %c0_13 = arith.constant 0 : index
    %20 = vector.load %arg2[%c0_12, %c0_13] : memref<8x128xf32, #tpu.memory_space<vmem>>, vector<8x128xf32>
    tpu.vector_store %arg2[%c0_12, %c0_13], %19 {strides = array<i32>} : memref<8x128xf32, #tpu.memory_space<vmem>>, vector<8x128xf32>,
    return
  }
}

</mosaic_0001>

<bundles_post_ra>
// kernel: fused_forward.1
= control target key start
LH: loop header
LB: loop body
LE: loop exit
PB: predicated region body
PF: predicated region fallthrough
CT: control target
= control target key end

     0   :  { %7 = vsyncpa [#allocation3], 0  ;;  %s611_s0 = inlined_call_operand.vmem [shape: f32[8,128], index: 0, kind: input, shape index: {}]   ;;  %s612_s1 = inlined_call_operand.hbm [shape: f32[408,128], index: 1, kind: input, shape index: {}]   ;;  %s613_s2 = inlined_call_operand.hbm [shape: f32[8,128], index: 2, kind: output, shape index: {}]  }
   0x1   :  { %8 = vsyncpa [#allocation4], 0  ;;  %s527_s9 = smov [#allocation2]  }
   0x2   :  { %s16_s10 = sshll.u32 %s527_s9, 4  ;;  %s17_s10 = int_to_ptr.vmem [resolvable:$true] %s16_s10 }
   0x3   :  { %s491_s11 = scalar_lea.vmem %s17_s10, 6528  ;;  %p496_p1 = scmp.lt.s32.totalorder %s17_s10, %s17_s10 }
   0x4   :  { %p492_p0 = scmp.ne.s32.totalorder %s17_s10, %s491_s11  ;;  %p497_p2 = scmp.lt.s32.totalorder %s491_s11, %s491_s11 }
   0x6   :  { %p498_p3 = por %p497_p2, %p496_p1 }
   0x8   :  { %p499_p4 = pnand %p498_p3, %p492_p0 }
   0xa   :  { %502 = shalt.err (!%p499_p4)
}
   0xb   :  { %s528_s12 = smov 128   ;;  %s529_s13 = smov 8  }
   0xc   :  { %22 = dma.hbm_to_vmem [thread:$0]  %s612_s1, 6528, %s17_s10, [#allocation3], %s528_s12, %s528_s12, %s529_s13  }
   0xd   :  { %523 = dma.done.wait [#allocation3], 6528  }
   0xe   :  { %524 = vsyncadd [#allocation3], 4294960768  ;;  %v530_v0 = vmov 0.0   ;;  %vm531_vm0 = vmmov 0   ;;  %v42_v1 = vld [vmem:[#allocation2 + $0x78] sm:$0xff]  ;;  %v41_v2 = vld [vmem:[#allocation2 + $0x70] sm:$0xff] }
   0xf   :  { %372 = vmatprep.subr.mxu0 %v530_v0  ;;  %404 = vmatprep.mubr.msk.f32.mxu0 %vm531_vm0, %v530_v0  ;;  %v40_v3 = vld [vmem:[#allocation2 + $0x68] sm:$0xff]  ;;  %v39_v4 = vld [vmem:[#allocation2 + $0x60] sm:$0xff]  ;;  %v38_v6 = vld [vmem:[#allocation2 + $0x58] sm:$0xff] }
  0x10   :  { %407 = vmatprep.subr.mxu1 %v530_v0  ;;  %439 = vmatprep.mubr.msk.f32.mxu1 %vm531_vm0, %v530_v0  ;;  %v134_v5 = vld [vmem:[#allocation2 + $0x100] sm:$0xff]  ;;  %v133_v7 = vld [vmem:[#allocation2 + $0xf8] sm:$0xff]  ;;  %v132_v8 = vld [vmem:[#allocation2 + $0xf0] sm:$0xff] }
  0x11   :  { %373 = vmatpush3.msra.mxu0 %v42_v1  ;;  %408 = vmatpush3.msra.mxu1 %v134_v5  ;;  %v37_v9 = vld [vmem:[#allocation2 + $0x50] sm:$0xff]  ;;  %v131_v10 = vld [vmem:[#allocation2 + $0xe8] sm:$0xff]  ;;  %v130_v12 = vld [vmem:[#allocation2 + $0xe0] sm:$0xff] }
  0x12   :  { %374 = vmatprep.subr.mxu0 %v530_v0  ;;  %409 = vmatprep.subr.mxu1 %v530_v0  ;;  %v36_v11 = vld [vmem:[#allocation2 + $0x48] sm:$0xff]  ;;  %v35_v13 = vld [vmem:[#allocation2 + $0x40] sm:$0xff]  ;;  %v129_v14 = vld [vmem:[#allocation2 + $0xd8] sm:$0xff] }
  0x13   :  { %375 = vmatpush3.msra.mxu0 %v41_v2  ;;  %410 = vmatpush3.msra.mxu1 %v133_v7  ;;  %v34_v15 = vld [vmem:[#allocation2 + $0x38] sm:$0xff]  ;;  %v128_v16 = vld [vmem:[#allocation2 + $0xd0] sm:$0xff]  ;;  %v127_v18 = vld [vmem:[#allocation2 + $0xc8] sm:$0xff] }
  0x14   :  { %376 = vmatprep.subr.mxu0 %v530_v0  ;;  %411 = vmatprep.subr.mxu1 %v530_v0  ;;  %v33_v17 = vld [vmem:[#allocation2 + $0x30] sm:$0xff]  ;;  %v32_v19 = vld [vmem:[#allocation2 + $0x28] sm:$0xff]  ;;  %v126_v20 = vld [vmem:[#allocation2 + $0xc0] sm:$0xff] }
  0x15   :  { %377 = vmatpush3.msra.mxu0 %v40_v3  ;;  %412 = vmatpush3.msra.mxu1 %v132_v8  ;;  %v31_v21 = vld [vmem:[#allocation2 + $0x20] sm:$0xff]  ;;  %v125_v22 = vld [vmem:[#allocation2 + $0xb8] sm:$0xff]  ;;  %v124_v24 = vld [vmem:[#allocation2 + $0xb0] sm:$0xff] }
  0x16   :  { %378 = vmatprep.subr.mxu0 %v530_v0  ;;  %413 = vmatprep.subr.mxu1 %v530_v0  ;;  %v30_v23 = vld [vmem:[#allocation2 + $0x18] sm:$0xff]  ;;  %v29_v25 = vld [vmem:[#allocation2 + $0x10] sm:$0xff]  ;;  %v123_v26 = vld [vmem:[#allocation2 + $0xa8] sm:$0xff] }
  0x17   :  { %379 = vmatpush3.msra.mxu0 %v39_v4  ;;  %414 = vmatpush3.msra.mxu1 %v131_v10  ;;  %v28_v27 = vld [vmem:[#allocation2 + $0x8] sm:$0xff]  ;;  %v122_v28 = vld [vmem:[#allocation2 + $0xa0] sm:$0xff]  ;;  %v121_v31 = vld [vmem:[#allocation2 + $0x98] sm:$0xff] }
  0x18   :  { %380 = vmatprep.subr.mxu0 %v530_v0  ;;  %415 = vmatprep.subr.mxu1 %v530_v0  ;;  %v27_v29 = vld [vmem:[#allocation2] sm:$0xff]  ;;  %v120_v32 = vld [vmem:[#allocation2 + $0x90] sm:$0xff]  ;;  %v119_v33 = vld [vmem:[#allocation2 + $0x88] sm:$0xff] }
  0x19   :  { %381 = vmatpush3.msra.mxu0 %v38_v6  ;;  %416 = vmatpush3.msra.mxu1 %v130_v12  ;;  %v26_v30 = vld [vmem:[%s611_s0] sm:$0xff]  ;;  %v226_v34 = vld [vmem:[#allocation2 + $0x188] sm:$0xff]  ;;  %v224_v36 = vld [vmem:[#allocation2 + $0x178] sm:$0xff]  ;;  %s532_s0 = smov [#allocation5]  }
  0x1a   :  { %382 = vmatprep.subr.mxu0 %v530_v0  ;;  %417 = vmatprep.subr.mxu1 %v530_v0  ;;  %v225_v35 = vld [vmem:[#allocation2 + $0x180] sm:$0xff]  ;;  %v223_v37 = vld [vmem:[#allocation2 + $0x170] sm:$0xff]  ;;  %v222_v38 = vld [vmem:[#allocation2 + $0x168] sm:$0xff]  ;;  %s309_s17 = sshll.u32 %s532_s0, 4  ;;  %s310_s17 = int_to_ptr.vmem [resolvable:$true] %s309_s17 }
  0x1b   :  { %383 = vmatpush3.msra.mxu0 %v37_v9  ;;  %418 = vmatpush3.msra.mxu1 %v129_v14  ;;  %v221_v39 = vld [vmem:[#allocation2 + $0x160] sm:$0xff]  ;;  %v220_v40 = vld [vmem:[#allocation2 + $0x158] sm:$0xff]  ;;  %v219_v41 = vld [vmem:[#allocation2 + $0x150] sm:$0xff]  ;;  %s503_s18 = scalar_lea.vmem %s310_s17, 128  ;;  %p508_p6 = scmp.lt.s32.totalorder %s310_s17, %s310_s17 }
  0x1c   :  { %384 = vmatprep.subr.mxu0 %v530_v0  ;;  %419 = vmatprep.subr.mxu1 %v530_v0  ;;  %v218_v42 = vld [vmem:[#allocation2 + $0x148] sm:$0xff]  ;;  %v217_v43 = vld [vmem:[#allocation2 + $0x140] sm:$0xff]  ;;  %v216_v44 = vld [vmem:[#allocation2 + $0x138] sm:$0xff]  ;;  %p504_p5 = scmp.ne.s32.totalorder %s310_s17, %s503_s18  ;;  %p509_p7 = scmp.lt.s32.totalorder %s503_s18, %s503_s18 }
  0x1d   :  { %385 = vmatpush3.msra.mxu0 %v36_v11  ;;  %420 = vmatpush3.msra.mxu1 %v128_v16  ;;  %v215_v45 = vld [vmem:[#allocation2 + $0x130] sm:$0xff]  ;;  %v214_v46 = vld [vmem:[#allocation2 + $0x128] sm:$0xff]  ;;  %v318_v47 = vld [vmem:[#allocation2 + $0x80] ss:$0 sm:$0xff] }
  0x1e   :  { %386 = vmatprep.subr.mxu0 %v530_v0  ;;  %421 = vmatprep.subr.mxu1 %v530_v0  ;;  %v213_v52 = vld [vmem:[#allocation2 + $0x120] sm:$0xff]  ;;  %v212_v53 = vld [vmem:[#allocation2 + $0x118] sm:$0xff]  ;;  %v211_v54 = vld [vmem:[#allocation2 + $0x110] sm:$0xff]  ;;  %p510_p8 = por %p509_p7, %p508_p6 }
  0x1f   :  { %387 = vmatpush3.msra.mxu0 %v35_v13  ;;  %422 = vmatpush3.msra.mxu1 %v127_v18  ;;  %v319_v55 = vld [vmem:[#allocation2 + $0x108] ss:$0 sm:$0xff]  ;;  %v320_v60 = vld [vmem:[#allocation2 + $0x190] ss:$0 sm:$0xff] }
  0x20   :  { %388 = vmatprep.subr.mxu0 %v530_v0  ;;  %423 = vmatprep.subr.mxu1 %v530_v0  ;;  %p511_p9 = pnand %p510_p8, %p504_p5 }
  0x21   :  { %389 = vmatpush3.msra.mxu0 %v34_v15  ;;  %424 = vmatpush3.msra.mxu1 %v126_v20 }
  0x22   :  { %390 = vmatprep.subr.mxu0 %v530_v0  ;;  %425 = vmatprep.subr.mxu1 %v530_v0 }
  0x23   :  { %391 = vmatpush3.msra.mxu0 %v33_v17  ;;  %426 = vmatpush3.msra.mxu1 %v125_v22 }
  0x24   :  { %392 = vmatprep.subr.mxu0 %v530_v0  ;;  %427 = vmatprep.subr.mxu1 %v530_v0 }
  0x25   :  { %393 = vmatpush3.msra.mxu0 %v32_v19  ;;  %428 = vmatpush3.msra.mxu1 %v124_v24 }
  0x26   :  { %394 = vmatprep.subr.mxu0 %v530_v0  ;;  %429 = vmatprep.subr.mxu1 %v530_v0 }
  0x27   :  { %395 = vmatpush3.msra.mxu0 %v31_v21  ;;  %430 = vmatpush3.msra.mxu1 %v123_v26 }
  0x28   :  { %396 = vmatprep.subr.mxu0 %v530_v0  ;;  %431 = vmatprep.subr.mxu1 %v530_v0 }
  0x29   :  { %397 = vmatpush3.msra.mxu0 %v30_v23  ;;  %432 = vmatpush3.msra.mxu1 %v122_v28 }
  0x2a   :  { %398 = vmatprep.subr.mxu0 %v530_v0  ;;  %433 = vmatprep.subr.mxu1 %v530_v0 }
  0x2b   :  { %399 = vmatpush3.msra.mxu0 %v29_v25  ;;  %434 = vmatpush3.msra.mxu1 %v121_v31 }
  0x2c   :  { %400 = vmatprep.subr.mxu0 %v530_v0  ;;  %435 = vmatprep.subr.mxu1 %v530_v0 }
  0x2d   :  { %401 = vmatpush3.msra.mxu0 %v28_v27  ;;  %436 = vmatpush3.msra.mxu1 %v120_v32 }
  0x2e   :  { %402 = vmatprep.subr.mxu0 %v530_v0  ;;  %437 = vmatprep.subr.mxu1 %v530_v0 }
  0x2f   :  { %403 = vmatpush3.msra.mxu0 %v27_v29  ;;  %438 = vmatpush3.msra.mxu1 %v119_v33 }
  0x30   :  { %405 = vmatmul.mubr.f32.vlgmr.msra.gmra.mxu0 %v26_v30  ;;  %442 = vmatprep.subr.mxu0 %v530_v0 }
  0x31   :  { %474 = vmatprep.mubr.msk.f32.mxu0 %vm531_vm0, %v530_v0  ;;  %443 = vmatpush3.msra.mxu0 %v226_v34 }
  0x32   :  { %444 = vmatprep.subr.mxu0 %v530_v0 }
  0x33   :  { %445 = vmatpush3.msra.mxu0 %v225_v35 }
  0x34   :  { %446 = vmatprep.subr.mxu0 %v530_v0 }
  0x35   :  { %447 = vmatpush3.msra.mxu0 %v224_v36 }
  0x36   :  { %448 = vmatprep.subr.mxu0 %v530_v0 }
  0x37   :  { %449 = vmatpush3.msra.mxu0 %v223_v37 }
  0x38   :  { %450 = vmatprep.subr.mxu0 %v530_v0 }
  0x39   :  { %451 = vmatpush3.msra.mxu0 %v222_v38 }
  0x3a   :  { %452 = vmatprep.subr.mxu0 %v530_v0 }
  0x3b   :  { %453 = vmatpush3.msra.mxu0 %v221_v39 }
  0x3c   :  { %454 = vmatprep.subr.mxu0 %v530_v0 }
  0x3d   :  { %455 = vmatpush3.msra.mxu0 %v220_v40 }
  0x3e   :  { %456 = vmatprep.subr.mxu0 %v530_v0 }
  0x3f   :  { %457 = vmatpush3.msra.mxu0 %v219_v41 }
  0x40   :  { %458 = vmatprep.subr.mxu0 %v530_v0 }
  0x41   :  { %459 = vmatpush3.msra.mxu0 %v218_v42 }
  0x42   :  { %460 = vmatprep.subr.mxu0 %v530_v0 }
  0x43   :  { %461 = vmatpush3.msra.mxu0 %v217_v43 }
  0x44   :  { %462 = vmatprep.subr.mxu0 %v530_v0 }
  0x45   :  { %463 = vmatpush3.msra.mxu0 %v216_v44 }
  0x46   :  { %464 = vmatprep.subr.mxu0 %v530_v0 }
  0x47   :  { %465 = vmatpush3.msra.mxu0 %v215_v45 }
  0x48   :  { %466 = vmatprep.subr.mxu0 %v530_v0 }
  0x49   :  { %467 = vmatpush3.msra.mxu0 %v214_v46 }
  0x4a   :  { %468 = vmatprep.subr.mxu0 %v530_v0 }
  0x4b   :  { %469 = vmatpush3.msra.mxu0 %v213_v52 }
  0x4c   :  { %470 = vmatprep.subr.mxu0 %v530_v0 }
  0x4d   :  { %471 = vmatpush3.msra.mxu0 %v212_v53 }
  0x4e   :  { %472 = vmatprep.subr.mxu0 %v530_v0 }
  0x4f   :  { %473 = vmatpush3.msra.mxu0 %v211_v54 }
  0xf0   :  { %v114_v48 = vpop.f32.mrf.mxu0 }
  0xf1   :  { %v115_v49 = vadd.f32 %v318_v47, %v114_v48 }
  0xf2   :  { %v406_v50 = vpop.f32.mrf.mxu0 }
  0xf3   :  { %v118_v51 = vmax.f32 %v115_v49, 0.0 }
  0xf5   :  { %440 = vmatmul.mubr.f32.vlgmr.msra.gmra.mxu1 %v118_v51 }
 0x1b5   :  { %v206_v56 = vpop.f32.mrf.mxu1 }
 0x1b6   :  { %v207_v57 = vadd.f32 %v319_v55, %v206_v56 }
 0x1b7   :  { %v441_v58 = vpop.f32.mrf.mxu1 }
 0x1b8   :  { %v210_v59 = vmax.f32 %v207_v57, 0.0 }
 0x1ba   :  { %475 = vmatmul.mubr.f32.vlgmr.msra.gmra.mxu0 %v210_v59 }
 0x27a   :  { %v298_v61 = vpop.f32.mrf.mxu0 }
 0x27b   :  { %v299_v62 = vadd.f32 %v320_v60, %v298_v61 }
 0x27c   :  { %v476_v63 = vpop.f32.mrf.mxu0 }
 0x27d   :  { %302 = vst [vmem:[#allocation5] sm:$0xff] %v299_v62 }
 0x27e   :  { %514 = shalt.err (!%p511_p9)
}
 0x27f   :  { %312 = dma.vmem_to_hbm [thread:$0]  %s310_s17, 128, %s613_s2, [#allocation4]  }
 0x280   :  { %525 = dma.done.wait [#allocation4], 128  }
 0x281   :  { %526 = vsyncadd [#allocation4], 4294967168 }
 0x282   :  { %316 = vsyncpa [#allocation3], 1 }
 0x283   :  { %317 = vsyncpa [#allocation4], 1 }

</bundles_post_ra>
